<compile_context>
chip_gen: v6e
topology: v6e:2x2x1
jax: 0.10.0
libtpu: 0.0.40
codegen_flags: <defaults>
</compile_context>

<pallas_src>
import functools
import math

import jax
import jax.numpy as jnp
from jax import lax
from jax.experimental import pallas as pl
from jax.experimental.pallas import tpu as pltpu


@functools.lru_cache(maxsize=None)
def _vmem_limit_bytes():
    """Per-chip VMEM budget with headroom (v7x: ~48 MiB, v5e/v6e: ~112 MiB)."""
    try:
        cap = int(pltpu.get_tpu_info().vmem_capacity_bytes)
    except Exception:
        cap = 64 * 1024 * 1024
    cap = max(cap, 64 * 1024 * 1024)
    return int(min(cap - 16 * 1024 * 1024, 112 * 1024 * 1024))


def _pick_tile(dim, target, align=1):
    """Largest divisor of `dim` that is <= target and a multiple of `align`.

    Falls back to the full extent (always a legal block) only if no aligned
    divisor exists; callers assert divisibility so remainders can never be
    silently dropped.
    """
    if dim <= target:
        return dim
    for t in range(target, 0, -1):
        if dim % t == 0 and t % align == 0:
            return t
    return dim


# ----------------------------- Pallas kernels ------------------------------ #

def _epilogue(acc, bias_ref, res_ref, o_ref, act):
    """Shared matmul epilogue: bias -> activation -> residual -> cast/store."""
    if bias_ref is not None:
        acc = acc + bias_ref[...].astype(jnp.float32)
    if act == "gelu":
        # tanh-GELU lowers to the EUP (its own VLIW slot) instead of a long
        # f32 erf polynomial on the VPU; numerics shift ~1e-3.
        acc = jax.nn.gelu(acc, approximate=True)
    if res_ref is not None:
        acc = acc + res_ref[...].astype(jnp.float32)
    o_ref[...] = acc.astype(o_ref.dtype)


def _make_linear_kernel(has_bias, has_residual, act, multi_k):
    """Tiled matmul y = act(x @ W^T + b) + res, W in PyTorch (N, K) layout."""

    def kernel(*refs):
        it = iter(refs)
        x_ref = next(it)                                   # (tm, tk) / (tm, K)
        w_ref = next(it)                                   # (tn, tk) / (tn, K)
        bias_ref = next(it) if has_bias else None          # (1, tn)
        res_ref = next(it) if has_residual else None       # (tm, tn)
        o_ref = next(it)                                   # (tm, tn)

        if multi_k:
            acc_ref = next(it)                             # (tm, tn) f32 scratch
            k = pl.program_id(2)

            @pl.when(k == 0)
            def _():
                acc_ref[...] = jnp.zeros_like(acc_ref)

            acc_ref[...] += lax.dot_general(
                x_ref[...].astype(jnp.bfloat16), w_ref[...].astype(jnp.bfloat16),
                dimension_numbers=(((1,), (1,)), ((), ())),
                preferred_element_type=jnp.float32)

            @pl.when(k == pl.num_programs(2) - 1)
            def _():
                _epilogue(acc_ref[...], bias_ref, res_ref, o_ref, act)
        else:
            # Single k step: no accumulator scratch / read-modify-write.
            acc = lax.dot_general(
                x_ref[...].astype(jnp.bfloat16), w_ref[...].astype(jnp.bfloat16),
                dimension_numbers=(((1,), (1,)), ((), ())),
                preferred_element_type=jnp.float32)
            _epilogue(acc, bias_ref, res_ref, o_ref, act)

    return kernel


def _make_ln_linear_kernel(has_bias, act, eps):
    """LayerNorm fused as the prologue of a projection: y = act(LN(x) @ W^T + b).

    The LN'd tile is computed once per M-tile (j == 0), cached in bf16 VMEM
    scratch and reused for every N-tile (feeds the MXU bf16 directly).
    """

    def kernel(*refs):
        if has_bias:
            x_ref, g_ref, b_ref, w_ref, bias_ref, o_ref, xn_ref = refs
        else:
            x_ref, g_ref, b_ref, w_ref, o_ref, xn_ref = refs
            bias_ref = None

        @pl.when(pl.program_id(1) == 0)
        def _():
            x = x_ref[...].astype(jnp.float32)
            mean = jnp.mean(x, axis=-1, keepdims=True)
            var = jnp.mean(jnp.square(x - mean), axis=-1, keepdims=True)
            xn = (x - mean) * lax.rsqrt(var + eps)
            xn = xn * g_ref[...].astype(jnp.float32) + b_ref[...].astype(jnp.float32)
            xn_ref[...] = xn.astype(xn_ref.dtype)          # bf16 cache

        acc = lax.dot_general(
            xn_ref[...], w_ref[...].astype(jnp.bfloat16),
            dimension_numbers=(((1,), (1,)), ((), ())),
            preferred_element_type=jnp.float32)
        _epilogue(acc, bias_ref, None, o_ref, act)

    return kernel


def _mha_kernel(q_ref, k_ref, v_ref, o_ref, m_sc, l_sc, acc_sc):
    """Flash-attention step for one (batch, head, q-tile, kv-tile) grid point.

    q_ref : (1, tq,  hd) bf16  (1/sqrt(hd) pre-folded into the q projection)
    k_ref : (1, tkv, hd) bf16
    v_ref : (1, tkv, hd) bf16
    o_ref : (1, tq,  hd) written on the last KV tile
    m_sc, l_sc : (tq, 128) f32 lane-broadcast running max / sum (whole-ref stores)
    acc_sc     : (tq, hd)  f32 output accumulator
    """
    s_idx = pl.program_id(3)

    @pl.when(s_idx == 0)
    def _():
        m_sc[...] = jnp.full_like(m_sc, -jnp.inf)
        l_sc[...] = jnp.zeros_like(l_sc)
        acc_sc[...] = jnp.zeros_like(acc_sc)

    q = q_ref[0, :, :]
    k = k_ref[0, :, :]
    v = v_ref[0, :, :]

    # Q @ K^T on the MXU (bf16 operands, f32 accumulation); scale already folded.
    s = lax.dot_general(q, k, dimension_numbers=(((1,), (1,)), ((), ())),
                        preferred_element_type=jnp.float32)           # (tq, tkv)

    m_prev = m_sc[...]                                                 # (tq, 128)
    m_new = jnp.maximum(m_prev, jnp.max(s, axis=-1, keepdims=True))   # (tq, 128)
    alpha = jnp.exp(m_prev - m_new)                                    # (tq, 128)
    p = jnp.exp(s - m_new[:, :1])                                      # (tq, tkv)

    l_sc[...] = alpha * l_sc[...] + jnp.sum(p, axis=-1, keepdims=True)
    acc_sc[...] = alpha[:, :1] * acc_sc[...] + lax.dot_general(
        p.astype(v.dtype), v, dimension_numbers=(((1,), (0,)), ((), ())),
        preferred_element_type=jnp.float32)
    m_sc[...] = m_new

    @pl.when(s_idx == pl.num_programs(3) - 1)
    def _():
        inv = pl.reciprocal(l_sc[...], approx=True)[:, :1]             # EUP slot
        o_ref[0, :, :] = (acc_sc[...] * inv).astype(o_ref.dtype)


# ------------------------------ Pallas wrappers ----------------------------- #

def linear(x2d, weight, bias=None, residual=None, act=None, out_dtype=None, *,
           tm=512, tn=512, tk=2048):
    """x2d: (M, K); weight: PyTorch layout (N, K), bf16; bias: (N,) f32 or None."""
    M, K = x2d.shape
    N, K2 = weight.shape
    assert K == K2
    if out_dtype is None:
        out_dtype = residual.dtype if residual is not None else x2d.dtype

    tm = _pick_tile(M, tm, 8)
    tn = _pick_tile(N, tn, 128)
    tk = _pick_tile(K, tk, 128)
    assert M % tm == 0 and N % tn == 0 and K % tk == 0, (M, N, K, tm, tn, tk)
    nk = K // tk
    multi_k = nk > 1

    if multi_k:
        grid = (M // tm, N // tn, nk)
        in_specs = [pl.BlockSpec((tm, tk), lambda i, j, k: (i, k)),
                    pl.BlockSpec((tn, tk), lambda i, j, k: (j, k))]
        bias_spec = pl.BlockSpec((1, tn), lambda i, j, k: (0, j))
        res_spec = pl.BlockSpec((tm, tn), lambda i, j, k: (i, j))
        out_spec = pl.BlockSpec((tm, tn), lambda i, j, k: (i, j))
        scratch = [pltpu.VMEM((tm, tn), jnp.float32)]
        dims = ("parallel", "parallel", "arbitrary")
    else:
        grid = (M // tm, N // tn)
        in_specs = [pl.BlockSpec((tm, K), lambda i, j: (i, 0)),
                    pl.BlockSpec((tn, K), lambda i, j: (j, 0))]
        bias_spec = pl.BlockSpec((1, tn), lambda i, j: (0, j))
        res_spec = pl.BlockSpec((tm, tn), lambda i, j: (i, j))
        out_spec = pl.BlockSpec((tm, tn), lambda i, j: (i, j))
        scratch = []
        dims = ("parallel", "parallel")

    args = [x2d, weight]
    if bias is not None:
        in_specs.append(bias_spec)
        args.append(bias.reshape(1, N))
    if residual is not None:
        in_specs.append(res_spec)
        args.append(residual)

    return pl.pallas_call(
        _make_linear_kernel(bias is not None, residual is not None, act, multi_k),
        out_shape=jax.ShapeDtypeStruct((M, N), out_dtype),
        grid=grid,
        in_specs=in_specs,
        out_specs=out_spec,
        scratch_shapes=scratch,
        compiler_params=pltpu.CompilerParams(
            dimension_semantics=dims,
            vmem_limit_bytes=_vmem_limit_bytes()),
    )(*args)


def ln_linear(x2d, gamma, beta, weight, bias=None, act=None, eps=1e-5,
              out_dtype=None, *, tm=256, tn=512):
    """Fused LayerNorm + projection. weight: (N, K) PyTorch layout (bf16), K untiled."""
    M, K = x2d.shape
    N = weight.shape[0]
    assert weight.shape[1] == K
    if out_dtype is None:
        out_dtype = x2d.dtype

    tm = _pick_tile(M, tm, 8)
    tn = _pick_tile(N, tn, 128)
    assert M % tm == 0 and N % tn == 0, (M, N, tm, tn)
    grid = (M // tm, N // tn)

    in_specs = [
        pl.BlockSpec((tm, K), lambda i, j: (i, 0)),
        pl.BlockSpec((1, K), lambda i, j: (0, 0)),
        pl.BlockSpec((1, K), lambda i, j: (0, 0)),
        pl.BlockSpec((tn, K), lambda i, j: (j, 0)),
    ]
    args = [x2d, gamma.reshape(1, K), beta.reshape(1, K), weight]
    if bias is not None:
        in_specs.append(pl.BlockSpec((1, tn), lambda i, j: (0, j)))
        args.append(bias.reshape(1, N))

    return pl.pallas_call(
        _make_ln_linear_kernel(bias is not None, act, eps),
        out_shape=jax.ShapeDtypeStruct((M, N), out_dtype),
        grid=grid,
        in_specs=in_specs,
        out_specs=pl.BlockSpec((tm, tn), lambda i, j: (i, j)),
        scratch_shapes=[pltpu.VMEM((tm, K), jnp.bfloat16)],   # cached LN(x) tile, bf16
        compiler_params=pltpu.CompilerParams(
            # j axis reuses the cached-LN scratch -> must stay sequential on a core.
            dimension_semantics=("parallel", "arbitrary"),
            vmem_limit_bytes=_vmem_limit_bytes()),
    )(*args)


def mha(q_src, k_src, v_src, *, num_heads, head_dim, q_head0, k_head0, v_head0,
        out_dtype, tq=256, tkv=512):
    """Flash attention over fused projection slabs, heads + q-tiles on the grid.

    q_src : (B, T, Wq)  query slab; head h's query columns are block q_head0+h
                        (block width = head_dim).
    k_src : (B, S, Wk)  key slab;   head h at block k_head0+h.
    v_src : (B, S, Wk)  value slab; head h at block v_head0+h.
    Returns (B, T, num_heads*head_dim).
    """
    B, T, _ = q_src.shape
    S = k_src.shape[1]
    D = num_heads * head_dim
    # TODO(synk): head_dim < 128 (real Whisper hd=64) needs the fused weights
    # re-packed in prepare_params so each head starts on a 128-lane boundary.
    assert head_dim % 128 == 0, "head_dim must be a multiple of 128 lanes"

    tq = _pick_tile(T, tq, 8)
    tkv = _pick_tile(S, tkv, 8)
    assert T % tq == 0 and S % tkv == 0, (T, S, tq, tkv)
    grid = (B, num_heads, T // tq, S // tkv)

    def q_map(off):
        return lambda b, h, t, s: (b, t, off + h)

    def kv_map(off):
        return lambda b, h, t, s: (b, s, off + h)

    return pl.pallas_call(
        _mha_kernel,
        out_shape=jax.ShapeDtypeStruct((B, T, D), out_dtype),
        grid=grid,
        in_specs=[
            pl.BlockSpec((1, tq, head_dim), q_map(q_head0)),
            pl.BlockSpec((1, tkv, head_dim), kv_map(k_head0)),
            pl.BlockSpec((1, tkv, head_dim), kv_map(v_head0)),
        ],
        out_specs=pl.BlockSpec((1, tq, head_dim), lambda b, h, t, s: (b, t, h)),
        scratch_shapes=[
            pltpu.VMEM((tq, 128), jnp.float32),       # running max m (lane-dense)
            pltpu.VMEM((tq, 128), jnp.float32),       # running sum l (lane-dense)
            pltpu.VMEM((tq, head_dim), jnp.float32),  # output accumulator
        ],
        compiler_params=pltpu.CompilerParams(
            dimension_semantics=("parallel", "parallel", "parallel", "arbitrary"),
            vmem_limit_bytes=_vmem_limit_bytes()),
    )(q_src, k_src, v_src)


# --------------------------- Decoder layer (glue) --------------------------- #

def prepare_params(raw):
    """One-time parameter prep: fuse QKV / KV weights, cast to bf16, fold softmax scale."""
    D = raw["fc2_w"].shape[0]
    H = raw["num_heads"]
    hd = D // H
    scale = 1.0 / math.sqrt(hd)
    bf16, f32 = jnp.bfloat16, jnp.float32
    zeros_d = jnp.zeros((D,), f32)

    sa, ca = raw["self_attn"], raw["cross_attn"]
    return {
        "num_heads": H,
        "ln1_g": raw["ln1_g"], "ln1_b": raw["ln1_b"],
        "ln2_g": raw["ln2_g"], "ln2_b": raw["ln2_b"],
        "ln3_g": raw["ln3_g"], "ln3_b": raw["ln3_b"],
        "fc1_w": raw["fc1_w"].astype(bf16), "fc1_b": raw["fc1_b"],
        "fc2_w": raw["fc2_w"].astype(bf16), "fc2_b": raw["fc2_b"],
        "self_attn": {
            # column order [K | V | Q]: head blocks k: h, v: H+h, q: 2H+h.
            # 1/sqrt(hd) is folded into the q projection (weights + bias).
            "kvq_w": jnp.concatenate(
                [sa["k_w"], sa["v_w"], scale * sa["q_w"]], axis=0).astype(bf16),
            "kvq_b": jnp.concatenate([zeros_d, sa["v_b"], scale * sa["q_b"]]),
            "o_w": sa["o_w"].astype(bf16), "o_b": sa["o_b"],
        },
        "cross_attn": {
            "q_w": (scale * ca["q_w"]).astype(bf16), "q_b": scale * ca["q_b"],
            "kv_w": jnp.concatenate([ca["k_w"], ca["v_w"]], axis=0).astype(bf16),
            "kv_b": jnp.concatenate([zeros_d, ca["v_b"]]),  # k_proj has no bias
            "o_w": ca["o_w"].astype(bf16), "o_b": ca["o_b"],
        },
    }


def precompute_cross_kv(params, encoder_hidden_states):
    """Encoder K/V projection, computed once and cached (as the real decoder does)."""
    B, S, D = encoder_hidden_states.shape
    ca = params["cross_attn"]
    enc2d = encoder_hidden_states.reshape(B * S, D).astype(jnp.bfloat16)
    kv = linear(enc2d, ca["kv_w"], ca["kv_b"], out_dtype=jnp.bfloat16)  # (B*S, 2D): [K|V]
    return kv.reshape(B, S, 2 * D)


def whisper_decoder_layer(params, hidden_states, encoder_hidden_states=None,
                          cross_kv=None):
    B, T, D = hidden_states.shape
    H = params["num_heads"]
    hd = D // H

    x2d = hidden_states.reshape(B * T, D)   # residual stream stays f32

    # ---- Self-attention: x = x + O(attn(LN1(x))) ----
    sa = params["self_attn"]
    kvq = ln_linear(x2d, params["ln1_g"], params["ln1_b"],
                    sa["kvq_w"], sa["kvq_b"], out_dtype=jnp.bfloat16)   # (B*T, 3D): [K|V|Q]
    kvq3 = kvq.reshape(B, T, 3 * D)                                     # free reshape
    attn = mha(kvq3, kvq3, kvq3, num_heads=H, head_dim=hd,
               q_head0=2 * H, k_head0=0, v_head0=H, out_dtype=jnp.bfloat16)
    x2d = linear(attn.reshape(B * T, D), sa["o_w"], sa["o_b"], residual=x2d)

    # ---- Cross-attention: x = x + O(attn(LN2(x), enc)) ----
    ca = params["cross_attn"]
    if cross_kv is None:
        cross_kv = precompute_cross_kv(params, encoder_hidden_states)
    q = ln_linear(x2d, params["ln2_g"], params["ln2_b"], ca["q_w"], ca["q_b"],
                  out_dtype=jnp.bfloat16)
    attn = mha(q.reshape(B, T, D), cross_kv, cross_kv, num_heads=H, head_dim=hd,
               q_head0=0, k_head0=0, v_head0=H, out_dtype=jnp.bfloat16)
    x2d = linear(attn.reshape(B * T, D), ca["o_w"], ca["o_b"], residual=x2d)

    # ---- Feed-forward: x = x + FC2(gelu(FC1(LN3(x)))) ----
    ff = ln_linear(x2d, params["ln3_g"], params["ln3_b"],
                   params["fc1_w"], params["fc1_b"], act="gelu",
                   out_dtype=jnp.bfloat16)
    x2d = linear(ff, params["fc2_w"], params["fc2_b"], residual=x2d)

    return x2d.reshape(B, T, D)


# ------------------------------ Pure-JAX reference --------------------------- #

def _ref_layer(params, x, enc):
    def ln(t, g, b):
        mu = t.mean(-1, keepdims=True)
        var = ((t - mu) ** 2).mean(-1, keepdims=True)
        return (t - mu) / jnp.sqrt(var + 1e-5) * g + b

    def attn(p, xq, kv, H):
        B, T, D = xq.shape
        S = kv.shape[1]
        hd = D // H
        q = xq @ p["q_w"].T + p["q_b"]
        k = kv @ p["k_w"].T
        v = kv @ p["v_w"].T + p["v_b"]
        q = q.reshape(B, T, H, hd).transpose(0, 2, 1, 3)
        k = k.reshape(B, S, H, hd).transpose(0, 2, 1, 3)
        v = v.reshape(B, S, H, hd).transpose(0, 2, 1, 3)
        s = jnp.einsum("bhtd,bhsd->bhts", q, k) / math.sqrt(hd)
        a = jax.nn.softmax(s, axis=-1)
        o = jnp.einsum("bhts,bhsd->bhtd", a, v)
        o = o.transpose(0, 2, 1, 3).reshape(B, T, D)
        return o @ p["o_w"].T + p["o_b"]

    H = params["num_heads"]
    h = x + attn(params["self_attn"], ln(x, params["ln1_g"], params["ln1_b"]),
                 ln(x, params["ln1_g"], params["ln1_b"]), H)
    h = h + attn(params["cross_attn"], ln(h, params["ln2_g"], params["ln2_b"]), enc, H)
    hn = ln(h, params["ln3_g"], params["ln3_b"])
    ff = jax.nn.gelu(hn @ params["fc1_w"].T + params["fc1_b"], approximate=False)
    return h + ff @ params["fc2_w"].T + params["fc2_b"]


# ------------------------------------ Main ----------------------------------- #

def _init_params(key, D, H, ffn):
    ks = iter(jax.random.split(key, 32))

    def w(shape, scale=0.02):
        return (scale * jax.random.normal(next(ks), shape)).astype(jnp.float32)

    def attn_params():
        return {
            "q_w": w((D, D)), "q_b": w((D,)),
            "k_w": w((D, D)),                      # k_proj has bias=False
            "v_w": w((D, D)), "v_b": w((D,)),
            "o_w": w((D, D)), "o_b": w((D,)),
        }

    return {
        "num_heads": H,
        "ln1_g": jnp.ones((D,), jnp.float32), "ln1_b": jnp.zeros((D,), jnp.float32),
        "ln2_g": jnp.ones((D,), jnp.float32), "ln2_b": jnp.zeros((D,), jnp.float32),
        "ln3_g": jnp.ones((D,), jnp.float32), "ln3_b": jnp.zeros((D,), jnp.float32),
        "self_attn": attn_params(),
        "cross_attn": attn_params(),
        "fc1_w": w((ffn, D)), "fc1_b": w((ffn,)),
        "fc2_w": w((D, ffn)), "fc2_b": w((D,)),
    }


if __name__ == "__main__":
    # Small but lane-aligned shapes: D multiple of 128 and head_dim = 128 so
    # per-head column blocks are lane-dense; N-tiling of the fused KVQ slab is
    # exercised (3D = 768 -> tn = 384).
    B, T, S, D, H, FFN = 2, 8, 16, 256, 2, 512
    key = jax.random.PRNGKey(0)
    k_p, k_x, k_e = jax.random.split(key, 3)

    raw_params = _init_params(k_p, D, H, FFN)
    params = prepare_params(raw_params)
    hidden_states = jax.random.normal(k_x, (B, T, D), jnp.float32)
    encoder_hidden_states = jax.random.normal(k_e, (B, S, D), jnp.float32)

    # Cross-attention K/V cache computed once (as the real decoder does across
    # layers / decode steps) and reused inside the layer.
    cross_kv = precompute_cross_kv(params, encoder_hidden_states)

    out = whisper_decoder_layer(params, hidden_states, cross_kv=cross_kv)
    out = jax.block_until_ready(out)

    ref = _ref_layer(raw_params, hidden_states, encoder_hidden_states)
    assert out.shape == (B, T, D)
    err = jnp.max(jnp.abs(out - ref))
    # bf16 MXU operands + tanh-GELU + approx reciprocal -> loosened tolerance.
    assert jnp.allclose(out, ref, atol=3e-2, rtol=3e-2), f"max abs err {err}"

    # Also exercise the multi-k accumulation path of `linear`.
    a = jax.random.normal(jax.random.PRNGKey(1), (16, 256), jnp.float32)
    wt = (0.02 * jax.random.normal(jax.random.PRNGKey(2), (128, 256))).astype(jnp.float32)
    y = jax.block_until_ready(linear(a, wt.astype(jnp.bfloat16), tk=128))
    assert jnp.allclose(y, a @ wt.T, atol=2e-2, rtol=2e-2)

    print("KERNEL_OK")
</pallas_src>

<mosaic_0001>
module attributes {stable_mosaic.version = 11 : i64} {
  func.func @kernel(%arg0: i32, %arg1: i32, %arg2: memref<32x256xbf16, #tpu.memory_space<vmem>>, %arg3: memref<512x256xbf16, #tpu.memory_space<vmem>>, %arg4: memref<1x512xf32, #tpu.memory_space<vmem>>, %arg5: memref<32x512xbf16, #tpu.memory_space<vmem>>) attributes {dimension_semantics = [#tpu.dimension_semantics<parallel>, #tpu.dimension_semantics<parallel>], iteration_bounds = array<i64: 1, 1>, scalar_prefetch = 0 : i64, scratch_operands = 0 : i64, tpu.core_type = #tpu.core_type<tc>, window_params = [{transform_indices = @transform_0, window_bounds = array<i64: 32, 256>}, {transform_indices = @transform_1, window_bounds = array<i64: 512, 256>}, {transform_indices = @transform_2, window_bounds = array<i64: 1, 512>}, {transform_indices = @transform_3, window_bounds = array<i64: 32, 512>}]} {
    %c0 = arith.constant 0 : index
    %c0_0 = arith.constant 0 : index
    %0 = vector.load %arg2[%c0, %c0_0] : memref<32x256xbf16, #tpu.memory_space<vmem>>, vector<32x256xbf16>
    %c0_1 = arith.constant 0 : index
    %c0_2 = arith.constant 0 : index
    %1 = vector.load %arg3[%c0_1, %c0_2] : memref<512x256xbf16, #tpu.memory_space<vmem>>, vector<512x256xbf16>
    %cst = arith.constant dense<0.000000e+00> : vector<32x512xf32>
    %2 = tpu.matmul %0, %1, %cst {dimension_numbers = #tpu.dot_dimension_numbers<[1], [1], [0], [0], [0, 0, 1, 0], [], []>} : vector<32x256xbf16>, vector<512x256xbf16>, vector<32x512xf32> -> vector<32x512xf32>
    %c0_3 = arith.constant 0 : index
    %c0_4 = arith.constant 0 : index
    %3 = vector.load %arg4[%c0_3, %c0_4] : memref<1x512xf32, #tpu.memory_space<vmem>>, vector<1x512xf32>
    %4 = vector.broadcast %3 : vector<1x512xf32> to vector<32x512xf32>
    %5 = arith.addf %2, %4 : vector<32x512xf32>
    %6 = arith.truncf %5 : vector<32x512xf32> to vector<32x512xbf16>
    %c0_5 = arith.constant 0 : index
    %c0_6 = arith.constant 0 : index
    %7 = vector.load %arg5[%c0_5, %c0_6] : memref<32x512xbf16, #tpu.memory_space<vmem>>, vector<32x512xbf16>
    tpu.vector_store %arg5[%c0_5, %c0_6], %6 {strides = array<i32>} : memref<32x512xbf16, #tpu.memory_space<vmem>>, vector<32x512xbf16>,
    return
  }
  func.func @transform_0(%arg0: i32, %arg1: i32) -> (i32, i32) {
    %c0_i32 = arith.constant 0 : i32
    %c0_i32_0 = arith.constant 0 : i32
    return %arg0, %c0_i32 : i32, i32
  }
  func.func @transform_1(%arg0: i32, %arg1: i32) -> (i32, i32) {
    %c0_i32 = arith.constant 0 : i32
    %c0_i32_0 = arith.constant 0 : i32
    return %arg1, %c0_i32 : i32, i32
  }
  func.func @transform_2(%arg0: i32, %arg1: i32) -> (i32, i32) {
    %c0_i32 = arith.constant 0 : i32
    %c0_i32_0 = arith.constant 0 : i32
    return %c0_i32, %arg1 : i32, i32
  }
  func.func @transform_3(%arg0: i32, %arg1: i32) -> (i32, i32) {
    %c0_i32 = arith.constant 0 : i32
    return %arg0, %arg1 : i32, i32
  }
}

</mosaic_0001>

<bundles_post_ra>
// kernel: tpu_custom_call.1
= control target key start
LH: loop header
LB: loop body
LE: loop exit
PB: predicated region body
PF: predicated region fallthrough
CT: control target
= control target key end

     0   :  { %8 = vsyncpa [#allocation3], 0  ;;  %s984_s0 = inlined_call_operand.hbm [shape: bf16[32,256], index: 0, kind: input, shape index: {}]   ;;  %s985_s1 = inlined_call_operand.hbm [shape: bf16[512,256], index: 1, kind: input, shape index: {}]   ;;  %s986_s2 = inlined_call_operand.hbm [shape: f32[1,512], index: 2, kind: input, shape index: {}]   ;;  %s987_s3 = inlined_call_operand.hbm [shape: bf16[32,512], index: 3, kind: output, shape index: {}]  }
   0x1   :  { %9 = vsyncpa [#allocation6], 0 }
   0x2   :  { %10 = vsyncpa [#allocation4], 0  ;;  %s944_s12 = smov [#allocation5]   ;;  %s945_s14 = smov [#allocation2]  }
   0x3   :  { %s28_s13 = sshll.u32 %s944_s12, 4  ;;  %s16_s15 = sshll.u32 %s945_s14, 4  ;;  %s29_s13 = int_to_ptr.vmem [resolvable:$true] %s28_s13  ;;  %s17_s15 = int_to_ptr.vmem [resolvable:$true] %s16_s15 }
   0x4   :  { %s866_s16 = scalar_lea.vmem %s29_s13, 8192  ;;  %p871_p1 = scmp.lt.s32.totalorder %s29_s13, %s29_s13 }
   0x5   :  { %p867_p0 = scmp.ne.s32.totalorder %s29_s13, %s866_s16  ;;  %p872_p2 = scmp.lt.s32.totalorder %s866_s16, %s866_s16 }
   0x7   :  { %p873_p3 = por %p872_p2, %p871_p1 }
   0x9   :  { %p874_p4 = pnand %p873_p3, %p867_p0 }
   0xb   :  { %877 = shalt.err (!%p874_p4)
}
   0xc   :  { %s946_s17 = smov 128   ;;  %s947_s18 = smov 8  }
   0xd   :  { %34 = dma.hbm_to_vmem [thread:$0]  %s985_s1, 8192, %s29_s13, [#allocation6], %s946_s17, %s946_s17, %s947_s18  }
   0xe   :  { %s886_s21 = scalar_lea.vmem %s17_s15, 512  ;;  %p891_p6 = scmp.lt.s32.totalorder %s17_s15, %s17_s15 }
   0xf   :  { %p887_p5 = scmp.ne.s32.totalorder %s17_s15, %s886_s21  ;;  %p892_p7 = scmp.lt.s32.totalorder %s886_s21, %s886_s21 }
  0x11   :  { %p893_p8 = por %p892_p7, %p891_p6 }
  0x13   :  { %p894_p9 = pnand %p893_p8, %p887_p5 }
  0x15   :  { %897 = shalt.err (!%p894_p9)
}
  0x16   :  { %22 = dma.hbm_to_vmem [thread:$0]  %s984_s0, 512, %s17_s15, [#allocation3], %s946_s17, %s946_s17, %s947_s18  }
  0x17   :  { %s948_s24 = smov [#allocation7]  }
  0x18   :  { %s41_s25 = sshll.u32 %s948_s24, 4  ;;  %s42_s25 = int_to_ptr.vmem [resolvable:$true] %s41_s25 }
  0x19   :  { %s906_s26 = scalar_lea.vmem %s42_s25, 64  ;;  %p911_p11 = scmp.lt.s32.totalorder %s42_s25, %s42_s25 }
  0x1a   :  { %p907_p10 = scmp.ne.s32.totalorder %s42_s25, %s906_s26  ;;  %p912_p12 = scmp.lt.s32.totalorder %s906_s26, %s906_s26 }
  0x1c   :  { %p913_p13 = por %p912_p12, %p911_p11 }
  0x1e   :  { %p914_p0 = pnand %p913_p13, %p907_p10 }
  0x20   :  { %917 = shalt.err (!%p914_p0)
}
  0x21   :  { %44 = dma.hbm_to_vmem [thread:$0]  %s986_s2, 64, %s42_s25, [#allocation6]  }
  0x22   :  { %938 = dma.done.wait [#allocation3], 512  }
  0x23   :  { %939 = vsyncadd [#allocation3], 4294966784 }
  0x24   :  { %940 = dma.done.wait [#allocation6], 8256  }
  0x25   :  { %941 = vsyncadd [#allocation6], 4294959040  ;;  %v756_v0 = vld [vmem:[#allocation5 + $0x74] ss:$8 sps:$4 sm:$0xff]   ;;  %v760_v2 = vld [vmem:[#allocation5 + $0x70] ss:$8 sps:$4 sm:$0xff]  }
  0x26   :  { %v758_v1 = vld [vmem:[#allocation5 + $0x174] ss:$8 sps:$4 sm:$0xff]   ;;  %484 = vmatprep.subr.bf16.mxu0 %v756_v0  ;;  %v761_v3 = vld [vmem:[#allocation5 + $0x170] ss:$8 sps:$4 sm:$0xff]   ;;  %v762_v4 = vld [vmem:[#allocation5 + $0x64] ss:$8 sps:$4 sm:$0xff]  }
  0x27   :  { %537 = vmatprep.subr.bf16.mxu1 %v758_v1  ;;  %485 = vmatpush1.bf16.xpose.msra.mxu0 %v760_v2  ;;  %v764_v5 = vld [vmem:[#allocation5 + $0x164] ss:$8 sps:$4 sm:$0xff]   ;;  %v766_v6 = vld [vmem:[#allocation5 + $0x60] ss:$8 sps:$4 sm:$0xff]   ;;  %v768_v8 = vld [vmem:[#allocation5 + $0x54] ss:$8 sps:$4 sm:$0xff]  }
  0x28   :  { %538 = vmatpush1.bf16.xpose.msra.mxu1 %v761_v3  ;;  %486 = vmatprep.subr.bf16.mxu0 %v762_v4  ;;  %v767_v7 = vld [vmem:[#allocation5 + $0x160] ss:$8 sps:$4 sm:$0xff]   ;;  %v770_v9 = vld [vmem:[#allocation5 + $0x154] ss:$8 sps:$4 sm:$0xff]   ;;  %v772_v10 = vld [vmem:[#allocation5 + $0x50] ss:$8 sps:$4 sm:$0xff]   ;;  %v124_v4 = vlaneseq }
  0x29   :  { %539 = vmatprep.subr.bf16.mxu1 %v764_v5  ;;  %v773_v11 = vld [vmem:[#allocation5 + $0x150] ss:$8 sps:$4 sm:$0xff]   ;;  %v774_v12 = vld [vmem:[#allocation5 + $0x44] ss:$8 sps:$4 sm:$0xff]   ;;  %v778_v14 = vld [vmem:[#allocation5 + $0x40] ss:$8 sps:$4 sm:$0xff]  }
  0x2a   :  { %v776_v13 = vld [vmem:[#allocation5 + $0x144] ss:$8 sps:$4 sm:$0xff]   ;;  %v779_v15 = vld [vmem:[#allocation5 + $0x140] ss:$8 sps:$4 sm:$0xff]   ;;  %v780_v16 = vld [vmem:[#allocation5 + $0x34] ss:$8 sps:$4 sm:$0xff]  }
  0x2b   :  { %v782_v17 = vld [vmem:[#allocation5 + $0x134] ss:$8 sps:$4 sm:$0xff]   ;;  %v784_v18 = vld [vmem:[#allocation5 + $0x30] ss:$8 sps:$4 sm:$0xff]   ;;  %v786_v20 = vld [vmem:[#allocation5 + $0x24] ss:$8 sps:$4 sm:$0xff]  }
  0x2c   :  { %v785_v19 = vld [vmem:[#allocation5 + $0x130] ss:$8 sps:$4 sm:$0xff]   ;;  %v788_v21 = vld [vmem:[#allocation5 + $0x124] ss:$8 sps:$4 sm:$0xff]   ;;  %v790_v22 = vld [vmem:[#allocation5 + $0x20] ss:$8 sps:$4 sm:$0xff]  }
  0x2d   :  { %v791_v23 = vld [vmem:[#allocation5 + $0x120] ss:$8 sps:$4 sm:$0xff]   ;;  %v792_v24 = vld [vmem:[#allocation5 + $0x14] ss:$8 sps:$4 sm:$0xff]   ;;  %v854_v26 = vld [vmem:[#allocation2 + $0x4] ss:$8 sps:$4 sm:$0xff]  }
  0x2e   :  { %v794_v25 = vld [vmem:[#allocation5 + $0x114] ss:$8 sps:$4 sm:$0xff]   ;;  %516 = vmatprep.mubr.bf16.mxu0 %v854_v26  ;;  %569 = vmatprep.mubr.bf16.mxu1 %v854_v26  ;;  %v796_v27 = vld [vmem:[#allocation5 + $0x10] ss:$8 sps:$4 sm:$0xff]   ;;  %v798_v29 = vld [vmem:[#allocation5 + $0x4] ss:$8 sps:$4 sm:$0xff]  }
  0x2f   :  { %487 = vmatpush1.bf16.xpose.msra.mxu0 %v766_v6  ;;  %v797_v28 = vld [vmem:[#allocation5 + $0x110] ss:$8 sps:$4 sm:$0xff]   ;;  %v800_v30 = vld [vmem:[#allocation5 + $0x104] ss:$8 sps:$4 sm:$0xff]   ;;  %v802_v31 = vld [vmem:[#allocation5] ss:$8 sps:$4 sm:$0xff]  }
  0x30   :  { %540 = vmatpush1.bf16.xpose.msra.mxu1 %v767_v7  ;;  %488 = vmatprep.subr.bf16.mxu0 %v768_v8  ;;  %v803_v32 = vld [vmem:[#allocation5 + $0x100] ss:$8 sps:$4 sm:$0xff]   ;;  %v804_v33 = vld [vmem:[#allocation5 + $0xf4] ss:$8 sps:$4 sm:$0xff]   ;;  %v808_v35 = vld [vmem:[#allocation5 + $0xf0] ss:$8 sps:$4 sm:$0xff]  }
  0x31   :  { %541 = vmatprep.subr.bf16.mxu1 %v770_v9  ;;  %v806_v34 = vld [vmem:[#allocation5 + $0x1f4] ss:$8 sps:$4 sm:$0xff]   ;;  %v809_v36 = vld [vmem:[#allocation5 + $0x1f0] ss:$8 sps:$4 sm:$0xff]   ;;  %v810_v37 = vld [vmem:[#allocation5 + $0xe4] ss:$8 sps:$4 sm:$0xff]  }
  0x32   :  { %v812_v38 = vld [vmem:[#allocation5 + $0x1e4] ss:$8 sps:$4 sm:$0xff]   ;;  %v814_v39 = vld [vmem:[#allocation5 + $0xe0] ss:$8 sps:$4 sm:$0xff]   ;;  %v816_v41 = vld [vmem:[#allocation5 + $0xd4] ss:$8 sps:$4 sm:$0xff]  }
  0x33   :  { %v815_v40 = vld [vmem:[#allocation5 + $0x1e0] ss:$8 sps:$4 sm:$0xff]   ;;  %v818_v42 = vld [vmem:[#allocation5 + $0x1d4] ss:$8 sps:$4 sm:$0xff]   ;;  %v820_v43 = vld [vmem:[#allocation5 + $0xd0] ss:$8 sps:$4 sm:$0xff]  }
  0x34   :  { %v821_v44 = vld [vmem:[#allocation5 + $0x1d0] ss:$8 sps:$4 sm:$0xff]   ;;  %v822_v45 = vld [vmem:[#allocation5 + $0xc4] ss:$8 sps:$4 sm:$0xff]   ;;  %v826_v47 = vld [vmem:[#allocation5 + $0xc0] ss:$8 sps:$4 sm:$0xff]  }
  0x35   :  { %v824_v46 = vld [vmem:[#allocation5 + $0x1c4] ss:$8 sps:$4 sm:$0xff]   ;;  %v827_v48 = vld [vmem:[#allocation5 + $0x1c0] ss:$8 sps:$4 sm:$0xff]   ;;  %v828_v49 = vld [vmem:[#allocation5 + $0xb4] ss:$8 sps:$4 sm:$0xff]  }
  0x36   :  { %v830_v50 = vld [vmem:[#allocation5 + $0x1b4] ss:$8 sps:$4 sm:$0xff]   ;;  %v832_v51 = vld [vmem:[#allocation5 + $0xb0] ss:$8 sps:$4 sm:$0xff]   ;;  %v834_v53 = vld [vmem:[#allocation5 + $0xa4] ss:$8 sps:$4 sm:$0xff]  }
  0x37   :  { %489 = vmatpush1.bf16.xpose.msra.mxu0 %v772_v10  ;;  %v833_v52 = vld [vmem:[#allocation5 + $0x1b0] ss:$8 sps:$4 sm:$0xff]   ;;  %v836_v54 = vld [vmem:[#allocation5 + $0x1a4] ss:$8 sps:$4 sm:$0xff]   ;;  %v838_v55 = vld [vmem:[#allocation5 + $0xa0] ss:$8 sps:$4 sm:$0xff]  }
  0x38   :  { %542 = vmatpush1.bf16.xpose.msra.mxu1 %v773_v11  ;;  %490 = vmatprep.subr.bf16.mxu0 %v774_v12  ;;  %v839_v56 = vld [vmem:[#allocation5 + $0x1a0] ss:$8 sps:$4 sm:$0xff]   ;;  %v840_v57 = vld [vmem:[#allocation5 + $0x94] ss:$8 sps:$4 sm:$0xff]   ;;  %v844_v59 = vld [vmem:[#allocation5 + $0x90] ss:$8 sps:$4 sm:$0xff]  }
  0x39   :  { %543 = vmatprep.subr.bf16.mxu1 %v776_v13  ;;  %v842_v58 = vld [vmem:[#allocation5 + $0x194] ss:$8 sps:$4 sm:$0xff]   ;;  %v845_v60 = vld [vmem:[#allocation5 + $0x190] ss:$8 sps:$4 sm:$0xff]   ;;  %v846_v61 = vld [vmem:[#allocation5 + $0x84] ss:$8 sps:$4 sm:$0xff]  }
  0x3a   :  { %v848_v62 = vld [vmem:[#allocation5 + $0x184] ss:$8 sps:$4 sm:$0xff]   ;;  %v850_v63 = vld [vmem:[#allocation5 + $0x80] ss:$8 sps:$4 sm:$0xff]   ;;  %v855_v2 = vld [vmem:[#allocation2 + $0x14] ss:$8 sps:$4 sm:$0xff]  }
  0x3b   :  { %v851_v0 = vld [vmem:[#allocation5 + $0x180] ss:$8 sps:$4 sm:$0xff]   ;;  %v857_v3 = vld [vmem:[#allocation2 + $0x10] ss:$8 sps:$4 sm:$0xff]   ;;  %v125_v5 = vshrl.u32 %v124_v4, 7  ;;  %s949_s0 = smov [#allocation8]  }
  0x3c   :  { %v852_v1 = vld [vmem:[#allocation2] ss:$8 sps:$4 sm:$0xff]   ;;  %s651_s2 = sshll.u32 %s949_s0, 4  ;;  %s652_s2 = int_to_ptr.vmem [resolvable:$true] %s651_s2 }
  0x3d   :  { %v126_v6 = vsub.s32 0, %v125_v5  ;;  %v134_v7 = vsub.s32 2, %v125_v5  ;;  %v130_v8 = vsub.s32 1, %v125_v5  ;;  %v138_v9 = vsub.s32 3, %v125_v5  ;;  %v122_v10 = vld [vmem:[#allocation7] sm:$0xf]  ;;  %p923_p2 = scmp.lt.s32.totalorder %s652_s2, %s652_s2 }
  0x3e   :  { %s918_s28 = scalar_lea.vmem %s652_s2, 1024 }
  0x3f   :  { %491 = vmatpush1.bf16.xpose.msra.mxu0 %v778_v14  ;;  %v127_v11 = vrot.slane %v122_v10, %v126_v6  ;;  %v135_v12 = vrot.slane %v122_v10, %v134_v7  ;;  %v131_v13 = vrot.slane %v122_v10, %v130_v8  ;;  %v139_v14 = vrot.slane %v122_v10, %v138_v9  ;;  %p919_p1 = scmp.ne.s32.totalorder %s652_s2, %s918_s28  ;;  %p924_p3 = scmp.lt.s32.totalorder %s918_s28, %s918_s28 }
  0x40   :  { %544 = vmatpush1.bf16.xpose.msra.mxu1 %v779_v15  ;;  %492 = vmatprep.subr.bf16.mxu0 %v780_v16 }
  0x41   :  { %545 = vmatprep.subr.bf16.mxu1 %v782_v17  ;;  %p925_p4 = por %p924_p3, %p923_p2 }
  0x43   :  { %p926_p5 = pnand %p925_p4, %p919_p1 }
  0x47   :  { %493 = vmatpush1.bf16.xpose.msra.mxu0 %v784_v18 }
  0x48   :  { %546 = vmatpush1.bf16.xpose.msra.mxu1 %v785_v19  ;;  %494 = vmatprep.subr.bf16.mxu0 %v786_v20 }
  0x49   :  { %547 = vmatprep.subr.bf16.mxu1 %v788_v21 }
  0x4f   :  { %495 = vmatpush1.bf16.xpose.msra.mxu0 %v790_v22 }
  0x50   :  { %548 = vmatpush1.bf16.xpose.msra.mxu1 %v791_v23  ;;  %496 = vmatprep.subr.bf16.mxu0 %v792_v24 }
  0x51   :  { %549 = vmatprep.subr.bf16.mxu1 %v794_v25 }
  0x57   :  { %497 = vmatpush1.bf16.xpose.msra.mxu0 %v796_v27 }
  0x58   :  { %550 = vmatpush1.bf16.xpose.msra.mxu1 %v797_v28  ;;  %498 = vmatprep.subr.bf16.mxu0 %v798_v29 }
  0x59   :  { %551 = vmatprep.subr.bf16.mxu1 %v800_v30 }
  0x5f   :  { %499 = vmatpush1.bf16.xpose.msra.mxu0 %v802_v31 }
  0x60   :  { %552 = vmatpush1.bf16.xpose.msra.mxu1 %v803_v32  ;;  %500 = vmatprep.subr.bf16.mxu0 %v804_v33 }
  0x61   :  { %553 = vmatprep.subr.bf16.mxu1 %v806_v34 }
  0x67   :  { %501 = vmatpush2.bf16.xpose.msra.mxu0 %v808_v35 }
  0x68   :  { %554 = vmatpush2.bf16.xpose.msra.mxu1 %v809_v36  ;;  %502 = vmatprep.subr.bf16.mxu0 %v810_v37 }
  0x69   :  { %555 = vmatprep.subr.bf16.mxu1 %v812_v38 }
  0x6f   :  { %503 = vmatpush2.bf16.xpose.msra.mxu0 %v814_v39 }
  0x70   :  { %556 = vmatpush2.bf16.xpose.msra.mxu1 %v815_v40  ;;  %504 = vmatprep.subr.bf16.mxu0 %v816_v41 }
  0x71   :  { %557 = vmatprep.subr.bf16.mxu1 %v818_v42 }
  0x77   :  { %505 = vmatpush2.bf16.xpose.msra.mxu0 %v820_v43 }
  0x78   :  { %558 = vmatpush2.bf16.xpose.msra.mxu1 %v821_v44  ;;  %506 = vmatprep.subr.bf16.mxu0 %v822_v45 }
  0x79   :  { %559 = vmatprep.subr.bf16.mxu1 %v824_v46 }
  0x7f   :  { %507 = vmatpush2.bf16.xpose.msra.mxu0 %v826_v47 }
  0x80   :  { %560 = vmatpush2.bf16.xpose.msra.mxu1 %v827_v48  ;;  %508 = vmatprep.subr.bf16.mxu0 %v828_v49 }
  0x81   :  { %561 = vmatprep.subr.bf16.mxu1 %v830_v50 }
  0x87   :  { %509 = vmatpush2.bf16.xpose.msra.mxu0 %v832_v51 }
  0x88   :  { %562 = vmatpush2.bf16.xpose.msra.mxu1 %v833_v52  ;;  %510 = vmatprep.subr.bf16.mxu0 %v834_v53 }
  0x89   :  { %563 = vmatprep.subr.bf16.mxu1 %v836_v54 }
  0x8f   :  { %511 = vmatpush2.bf16.xpose.msra.mxu0 %v838_v55 }
  0x90   :  { %564 = vmatpush2.bf16.xpose.msra.mxu1 %v839_v56  ;;  %512 = vmatprep.subr.bf16.mxu0 %v840_v57 }
  0x91   :  { %565 = vmatprep.subr.bf16.mxu1 %v842_v58 }
  0x97   :  { %513 = vmatpush2.bf16.xpose.msra.mxu0 %v844_v59 }
  0x98   :  { %566 = vmatpush2.bf16.xpose.msra.mxu1 %v845_v60  ;;  %514 = vmatprep.subr.bf16.mxu0 %v846_v61 }
  0x99   :  { %567 = vmatprep.subr.bf16.mxu1 %v848_v62 }
  0x9f   :  { %515 = vmatpush2.bf16.xpose.msra.mxu0 %v850_v63 }
  0xa0   :  { %568 = vmatpush2.bf16.xpose.msra.mxu1 %v851_v0 }
  0xa6   :  { %517 = vmatmul.mubr.bf16.vlgmr.msra.gmra.mxu0 %v852_v1 }
  0xa7   :  { %570 = vmatmul.mubr.bf16.vlgmr.msra.gmra.mxu1 %v852_v1  ;;  %526 = vmatprep.mubr.bf16.mxu0 %v855_v2 }
  0xa8   :  { %579 = vmatprep.mubr.bf16.mxu1 %v855_v2 }
  0xae   :  { %527 = vmatmul.mubr.bf16.gmra.mxu0 %v857_v3 }
  0xaf   :  { %580 = vmatmul.mubr.bf16.gmra.mxu1 %v857_v3 }
 0x166   :  { %v518_v15 = vpop.f32.mrf.mxu0 }
 0x167   :  { %v571_v16 = vpop.f32.mrf.mxu1  ;;  %v519_v19 = vadd.f32 %v518_v15, %v127_v11 }
 0x168   :  { %v520_v17 = vpop.f32.mrf.mxu0  ;;  %v572_v20 = vadd.f32 %v571_v16, %v135_v12 }
 0x169   :  { %v573_v18 = vpop.f32.mrf.mxu1  ;;  %v521_v21 = vadd.f32 %v520_v17, %v131_v13 }
 0x16a   :  { %v574_v22 = vadd.f32 %v573_v18, %v139_v14  ;;  %v522_v23 = vpop.f32.mrf.mxu0 }
 0x16b   :  { %v575_v24 = vpop.f32.mrf.mxu1  ;;  %v740_v25 = vpack.c.bf16 %v521_v21, %v519_v19  ;;  %v523_v29 = vadd.f32 %v522_v23, %v127_v11 }
 0x16c   :  { %v741_v26 = vpack.c.bf16 %v574_v22, %v572_v20  ;;  %v524_v27 = vpop.f32.mrf.mxu0  ;;  %v576_v30 = vadd.f32 %v575_v24, %v135_v12 }
 0x16d   :  { %v577_v28 = vpop.f32.mrf.mxu1  ;;  %638 = vst [vmem:[#allocation8] sm:$0xff] %v740_v25  ;;  %v525_v31 = vadd.f32 %v524_v27, %v131_v13 }
 0x16e   :  { %639 = vst [vmem:[#allocation8 + $0x8] sm:$0xff] %v741_v26  ;;  %v578_v32 = vadd.f32 %v577_v28, %v139_v14  ;;  %v528_v33 = vpop.f32.mrf.mxu0 }
 0x16f   :  { %v581_v34 = vpop.f32.mrf.mxu1  ;;  %v742_v35 = vpack.c.bf16 %v525_v31, %v523_v29  ;;  %v529_v39 = vadd.f32 %v528_v33, %v127_v11 }
 0x170   :  { %v743_v36 = vpack.c.bf16 %v578_v32, %v576_v30  ;;  %v530_v37 = vpop.f32.mrf.mxu0  ;;  %v582_v40 = vadd.f32 %v581_v34, %v135_v12 }
 0x171   :  { %v583_v38 = vpop.f32.mrf.mxu1  ;;  %640 = vst [vmem:[#allocation8 + $0x10] sm:$0xff] %v742_v35  ;;  %v531_v41 = vadd.f32 %v530_v37, %v131_v13 }
 0x172   :  { %641 = vst [vmem:[#allocation8 + $0x18] sm:$0xff] %v743_v36  ;;  %v584_v42 = vadd.f32 %v583_v38, %v139_v14  ;;  %v532_v43 = vpop.f32.mrf.mxu0 }
 0x173   :  { %v585_v44 = vpop.f32.mrf.mxu1  ;;  %v744_v45 = vpack.c.bf16 %v531_v41, %v529_v39  ;;  %v533_v49 = vadd.f32 %v532_v43, %v127_v11 }
 0x174   :  { %v745_v46 = vpack.c.bf16 %v584_v42, %v582_v40  ;;  %v534_v47 = vpop.f32.mrf.mxu0  ;;  %v586_v50 = vadd.f32 %v585_v44, %v135_v12 }
 0x175   :  { %v587_v48 = vpop.f32.mrf.mxu1  ;;  %642 = vst [vmem:[#allocation8 + $0x20] sm:$0xff] %v744_v45  ;;  %v535_v51 = vadd.f32 %v534_v47, %v131_v13 }
 0x176   :  { %643 = vst [vmem:[#allocation8 + $0x28] sm:$0xff] %v745_v46  ;;  %v588_v52 = vadd.f32 %v587_v48, %v139_v14 }
 0x177   :  { %v746_v53 = vpack.c.bf16 %v535_v51, %v533_v49 }
 0x178   :  { %v747_v54 = vpack.c.bf16 %v588_v52, %v586_v50 }
 0x179   :  { %644 = vst [vmem:[#allocation8 + $0x30] sm:$0xff] %v746_v53 }
 0x17a   :  { %645 = vst [vmem:[#allocation8 + $0x38] sm:$0xff] %v747_v54 }
 0x17b   :  { %929 = shalt.err (!%p926_p5)
}
 0x17c   :  { %s950_s29 = smov 256   ;;  %s951_s30 = smov 16  }
 0x17d   :  { %657 = dma.vmem_to_hbm [thread:$0]  %s652_s2, 1024, %s987_s3, [#allocation4], %s950_s29, %s950_s29, %s951_s30  }
 0x17e   :  { %942 = dma.done.wait [#allocation4], 1024  }
 0x17f   :  { %943 = vsyncadd [#allocation4], 4294966272 }
 0x180   :  { %661 = vsyncpa [#allocation3], 1 }
 0x181   :  { %662 = vsyncpa [#allocation6], 1 }
 0x182   :  { %663 = vsyncpa [#allocation4], 1 }

</bundles_post_ra>
